<compile_context>
chip_gen: v5e
topology: v5e:2x2
jax: 0.10.0
libtpu: 0.0.40
codegen_flags: <defaults>
</compile_context>

<pallas_src>
import functools

import numpy as np
import jax
import jax.numpy as jnp
from jax.experimental import pallas as pl
from jax.experimental.pallas import tpu as pltpu


# ------------------------------- kernel ---------------------------------- #
def bisenet_output_kernel(x_ref, mask_ref, w1_ref, scale_ref, shift_ref,
                          w2_ref, out_ref, *, W):
    x = x_ref[0]                                  # (Cin, HW), lane dim = HW
    HW = x.shape[-1]
    cmid = w1_ref.shape[1]

    # 3x3 conv as 9 accumulated matmuls over shifted (and boundary-masked) x.
    mid = jnp.zeros((cmid, HW), jnp.float32)
    for ky in range(3):
        for kx in range(3):
            k = ky * 3 + kx
            d = (ky - 1) * W + (kx - 1)           # flattened spatial offset
            if d == 0:
                xs = x
            else:
                # shifted[p] = x[p + d]  (wrap-around killed by the mask)
                xs = pltpu.roll(x, shift=(-d) % HW, axis=1) * mask_ref[k]
            mid = mid + jnp.dot(w1_ref[k], xs,
                                preferred_element_type=jnp.float32)

    # Folded BatchNorm (eval-mode) + ReLU, on the VMEM-resident intermediate.
    mid = jnp.maximum(mid * scale_ref[...] + shift_ref[...], 0.0)

    # 1x1 conv: (Ncls, Cmid) @ (Cmid, HW) -> lane-dense (Ncls, HW) store.
    out_ref[0] = jnp.dot(w2_ref[...], mid,
                         preferred_element_type=jnp.float32).astype(out_ref.dtype)


# ------------------------------- wrapper ---------------------------------- #
@jax.jit
def bisenet_output(x, params):
    """x: (N, Cin, H, W) float32. Returns (N, n_classes, H, W) float32."""
    N, Cin, H, W = x.shape
    HW = H * W

    w1 = params["w1"].astype(jnp.float32)         # (Cmid, Cin, 3, 3) - conv
    w2 = params["w2"].astype(jnp.float32)         # (Ncls, Cmid)      - conv_out
    Cmid = w1.shape[0]
    Ncls = w2.shape[0]

    # Fold eval-mode BatchNorm into per-channel scale/shift.
    # TODO(synk): training-mode batch statistics not reproduced; running stats
    # are folded into scale/shift (standard inference semantics).
    eps = 1e-5
    scale = (params["gamma"] / jnp.sqrt(params["run_var"] + eps)).astype(jnp.float32)
    shift = (params["beta"] - params["run_mean"] * scale).astype(jnp.float32)
    scale = scale.reshape(Cmid, 1)
    shift = shift.reshape(Cmid, 1)

    # (Cmid, Cin, 3, 3) -> (9, Cmid, Cin); tap k = ky*3 + kx.
    w1_taps = jnp.transpose(w1, (2, 3, 0, 1)).reshape(9, Cmid, Cin)

    # Constant zero-padding boundary masks for the 9 taps (built at trace time).
    r = np.arange(H).reshape(H, 1)
    c = np.arange(W).reshape(1, W)
    masks_np = np.zeros((9, 1, HW), np.float32)
    for ky in range(3):
        for kx in range(3):
            dy, dx = ky - 1, kx - 1
            m = ((r + dy >= 0) & (r + dy < H) &
                 (c + dx >= 0) & (c + dx < W)).astype(np.float32)
            masks_np[ky * 3 + kx, 0] = m.reshape(HW)
    masks = jnp.asarray(masks_np)

    # NCHW -> (N, Cin, HW): a free (metadata-only) reshape, no transpose.
    x_flat = x.reshape(N, Cin, HW).astype(jnp.float32)

    kernel = functools.partial(bisenet_output_kernel, W=W)

    out = pl.pallas_call(
        kernel,
        out_shape=jax.ShapeDtypeStruct((N, Ncls, HW), jnp.float32),
        grid_spec=pltpu.PrefetchScalarGridSpec(
            num_scalar_prefetch=0,
            grid=(N,),
            in_specs=[
                pl.BlockSpec((1, Cin, HW), lambda b: (b, 0, 0)),
                pl.BlockSpec((9, 1, HW), lambda b: (0, 0, 0)),
                pl.BlockSpec((9, Cmid, Cin), lambda b: (0, 0, 0)),
                pl.BlockSpec((Cmid, 1), lambda b: (0, 0)),
                pl.BlockSpec((Cmid, 1), lambda b: (0, 0)),
                pl.BlockSpec((Ncls, Cmid), lambda b: (0, 0)),
            ],
            out_specs=pl.BlockSpec((1, Ncls, HW), lambda b: (b, 0, 0)),
        ),
        compiler_params=pltpu.CompilerParams(
            dimension_semantics=("parallel",),
            vmem_limit_bytes=32 * 1024 * 1024),
    )(x_flat, masks, w1_taps, scale, shift, w2)

    # (N, Ncls, HW) -> (N, Ncls, H, W): free reshape (already channels-first).
    return out.reshape(N, Ncls, H, W)


# --------------------------- reference (pure JAX) -------------------------- #
def bisenet_output_reference(x, params):
    eps = 1e-5
    hp = jax.lax.Precision.HIGHEST
    w1 = params["w1"]                              # (Cmid, Cin, 3, 3)
    w2 = params["w2"]                              # (Ncls, Cmid)
    N, Cin, H, W = x.shape
    Cmid = w1.shape[0]

    xp = jnp.pad(x, ((0, 0), (0, 0), (1, 1), (1, 1)))
    y = jnp.zeros((N, Cmid, H, W), jnp.float32)
    for ky in range(3):
        for kx in range(3):
            y = y + jnp.einsum("oi,nihw->nohw", w1[:, :, ky, kx],
                               xp[:, :, ky:ky + H, kx:kx + W], precision=hp)

    scale = params["gamma"] / jnp.sqrt(params["run_var"] + eps)
    shift = params["beta"] - params["run_mean"] * scale
    y = jnp.maximum(y * scale[None, :, None, None]
                    + shift[None, :, None, None], 0.0)
    return jnp.einsum("oc,nchw->nohw", w2, y, precision=hp)


if __name__ == "__main__":
    key = jax.random.PRNGKey(0)
    k_x, k_w1, k_w2, k_g, k_b = jax.random.split(key, 5)

    # Small shapes consistent with the module:
    #   in_chan=4, mid_chan=32, n_classes=8, spatial 16x16, batch 2.
    N, Cin, H, W = 2, 4, 16, 16
    Cmid, Ncls = 32, 8

    x = jax.random.normal(k_x, (N, Cin, H, W), jnp.float32)
    params = {
        # conv (3x3, bias-free) weight in PyTorch layout (out, in, 3, 3)
        "w1": jax.random.normal(k_w1, (Cmid, Cin, 3, 3), jnp.float32) * 0.1,
        # conv_out (1x1, bias-free) weight flattened to (n_classes, mid_chan)
        "w2": jax.random.normal(k_w2, (Ncls, Cmid), jnp.float32) * 0.1,
        # BatchNorm (eval-mode / running-stat semantics)
        "gamma": 1.0 + 0.1 * jax.random.normal(k_g, (Cmid,), jnp.float32),
        "beta": 0.1 * jax.random.normal(k_b, (Cmid,), jnp.float32),
        "run_mean": jnp.zeros((Cmid,), jnp.float32),
        "run_var": jnp.ones((Cmid,), jnp.float32),
    }

    out = bisenet_output(x, params)
    out = jax.block_until_ready(out)

    ref = bisenet_output_reference(x, params)
    assert out.shape == (N, Ncls, H, W)
    assert jnp.allclose(out, ref, atol=1e-3, rtol=1e-3), "mismatch vs reference"

    print("KERNEL_OK")
</pallas_src>

<mosaic_0001>
module attributes {stable_mosaic.version = 11 : i64} {
  func.func @bisenet_output_kernel(%arg0: i32, %arg1: memref<1x4x256xf32, #tpu.memory_space<vmem>>, %arg2: memref<9x1x256xf32, #tpu.memory_space<vmem>>, %arg3: memref<9x32x4xf32, #tpu.memory_space<vmem>>, %arg4: memref<32x1xf32, #tpu.memory_space<vmem>>, %arg5: memref<32x1xf32, #tpu.memory_space<vmem>>, %arg6: memref<8x32xf32, #tpu.memory_space<vmem>>, %arg7: memref<1x8x256xf32, #tpu.memory_space<vmem>>) attributes {dimension_semantics = [#tpu.dimension_semantics<parallel>], iteration_bounds = array<i64: 2>, scalar_prefetch = 0 : i64, scratch_operands = 0 : i64, tpu.core_type = #tpu.core_type<tc>, window_params = [{transform_indices = @transform_0, window_bounds = array<i64: 1, 4, 256>}, {pipeline_mode = #tpu.pipeline_mode<synchronous>, transform_indices = @transform_1, window_bounds = array<i64: 9, 1, 256>}, {pipeline_mode = #tpu.pipeline_mode<synchronous>, transform_indices = @transform_2, window_bounds = array<i64: 9, 32, 4>}, {pipeline_mode = #tpu.pipeline_mode<synchronous>, transform_indices = @transform_3, window_bounds = array<i64: 32, 1>}, {pipeline_mode = #tpu.pipeline_mode<synchronous>, transform_indices = @transform_4, window_bounds = array<i64: 32, 1>}, {pipeline_mode = #tpu.pipeline_mode<synchronous>, transform_indices = @transform_5, window_bounds = array<i64: 8, 32>}, {transform_indices = @transform_6, window_bounds = array<i64: 1, 8, 256>}]} {
    %c0 = arith.constant 0 : index
    %c0_0 = arith.constant 0 : index
    %c0_1 = arith.constant 0 : index
    %0 = vector.load %arg1[%c0, %c0_0, %c0_1] : memref<1x4x256xf32, #tpu.memory_space<vmem>>, vector<1x4x256xf32>
    %1 = vector.shape_cast %0 : vector<1x4x256xf32> to vector<4x256xf32>
    %cst = arith.constant 0.000000e+00 : f32
    %2 = vector.broadcast %cst : f32 to vector<32x256xf32>
    %c17_i32 = arith.constant 17 : i32
    %3 = tpu.dynamic_rotate %1 by %c17_i32 dim 1 : vector<4x256xf32>, i32 -> vector<4x256xf32>
    %c0_2 = arith.constant 0 : index
    %c0_3 = arith.constant 0 : index
    %c0_4 = arith.constant 0 : index
    %4 = vector.load %arg2[%c0_2, %c0_3, %c0_4] : memref<9x1x256xf32, #tpu.memory_space<vmem>>, vector<1x1x256xf32>
    %5 = vector.shape_cast %4 : vector<1x1x256xf32> to vector<1x256xf32>
    %6 = vector.broadcast %5 : vector<1x256xf32> to vector<4x256xf32>
    %7 = arith.mulf %3, %6 : vector<4x256xf32>
    %c0_5 = arith.constant 0 : index
    %c0_6 = arith.constant 0 : index
    %c0_7 = arith.constant 0 : index
    %8 = vector.load %arg3[%c0_5, %c0_6, %c0_7] : memref<9x32x4xf32, #tpu.memory_space<vmem>>, vector<1x32x4xf32>
    %9 = vector.shape_cast %8 : vector<1x32x4xf32> to vector<32x4xf32>
    %cst_8 = arith.constant dense<0.000000e+00> : vector<32x256xf32>
    %10 = tpu.matmul %9, %7, %cst_8 {dimension_numbers = #tpu.dot_dimension_numbers<[1], [0], [0], [1], [0, 0, 1, 1], [], []>} : vector<32x4xf32>, vector<4x256xf32>, vector<32x256xf32> -> vector<32x256xf32>
    %11 = arith.addf %2, %10 : vector<32x256xf32>
    %c16_i32 = arith.constant 16 : i32
    %12 = tpu.dynamic_rotate %1 by %c16_i32 dim 1 : vector<4x256xf32>, i32 -> vector<4x256xf32>
    %c1 = arith.constant 1 : index
    %c0_9 = arith.constant 0 : index
    %c0_10 = arith.constant 0 : index
    %13 = vector.load %arg2[%c1, %c0_9, %c0_10] : memref<9x1x256xf32, #tpu.memory_space<vmem>>, vector<1x1x256xf32>
    %14 = vector.shape_cast %13 : vector<1x1x256xf32> to vector<1x256xf32>
    %15 = vector.broadcast %14 : vector<1x256xf32> to vector<4x256xf32>
    %16 = arith.mulf %12, %15 : vector<4x256xf32>
    %c1_11 = arith.constant 1 : index
    %c0_12 = arith.constant 0 : index
    %c0_13 = arith.constant 0 : index
    %17 = vector.load %arg3[%c1_11, %c0_12, %c0_13] : memref<9x32x4xf32, #tpu.memory_space<vmem>>, vector<1x32x4xf32>
    %18 = vector.shape_cast %17 : vector<1x32x4xf32> to vector<32x4xf32>
    %cst_14 = arith.constant dense<0.000000e+00> : vector<32x256xf32>
    %19 = tpu.matmul %18, %16, %cst_14 {dimension_numbers = #tpu.dot_dimension_numbers<[1], [0], [0], [1], [0, 0, 1, 1], [], []>} : vector<32x4xf32>, vector<4x256xf32>, vector<32x256xf32> -> vector<32x256xf32>
    %20 = arith.addf %11, %19 : vector<32x256xf32>
    %c15_i32 = arith.constant 15 : i32
    %21 = tpu.dynamic_rotate %1 by %c15_i32 dim 1 : vector<4x256xf32>, i32 -> vector<4x256xf32>
    %c2 = arith.constant 2 : index
    %c0_15 = arith.constant 0 : index
    %c0_16 = arith.constant 0 : index
    %22 = vector.load %arg2[%c2, %c0_15, %c0_16] : memref<9x1x256xf32, #tpu.memory_space<vmem>>, vector<1x1x256xf32>
    %23 = vector.shape_cast %22 : vector<1x1x256xf32> to vector<1x256xf32>
    %24 = vector.broadcast %23 : vector<1x256xf32> to vector<4x256xf32>
    %25 = arith.mulf %21, %24 : vector<4x256xf32>
    %c2_17 = arith.constant 2 : index
    %c0_18 = arith.constant 0 : index
    %c0_19 = arith.constant 0 : index
    %26 = vector.load %arg3[%c2_17, %c0_18, %c0_19] : memref<9x32x4xf32, #tpu.memory_space<vmem>>, vector<1x32x4xf32>
    %27 = vector.shape_cast %26 : vector<1x32x4xf32> to vector<32x4xf32>
    %cst_20 = arith.constant dense<0.000000e+00> : vector<32x256xf32>
    %28 = tpu.matmul %27, %25, %cst_20 {dimension_numbers = #tpu.dot_dimension_numbers<[1], [0], [0], [1], [0, 0, 1, 1], [], []>} : vector<32x4xf32>, vector<4x256xf32>, vector<32x256xf32> -> vector<32x256xf32>
    %29 = arith.addf %20, %28 : vector<32x256xf32>
    %c1_i32 = arith.constant 1 : i32
    %30 = tpu.dynamic_rotate %1 by %c1_i32 dim 1 : vector<4x256xf32>, i32 -> vector<4x256xf32>
    %c3 = arith.constant 3 : index
    %c0_21 = arith.constant 0 : index
    %c0_22 = arith.constant 0 : index
    %31 = vector.load %arg2[%c3, %c0_21, %c0_22] : memref<9x1x256xf32, #tpu.memory_space<vmem>>, vector<1x1x256xf32>
    %32 = vector.shape_cast %31 : vector<1x1x256xf32> to vector<1x256xf32>
    %33 = vector.broadcast %32 : vector<1x256xf32> to vector<4x256xf32>
    %34 = arith.mulf %30, %33 : vector<4x256xf32>
    %c3_23 = arith.constant 3 : index
    %c0_24 = arith.constant 0 : index
    %c0_25 = arith.constant 0 : index
    %35 = vector.load %arg3[%c3_23, %c0_24, %c0_25] : memref<9x32x4xf32, #tpu.memory_space<vmem>>, vector<1x32x4xf32>
    %36 = vector.shape_cast %35 : vector<1x32x4xf32> to vector<32x4xf32>
    %cst_26 = arith.constant dense<0.000000e+00> : vector<32x256xf32>
    %37 = tpu.matmul %36, %34, %cst_26 {dimension_numbers = #tpu.dot_dimension_numbers<[1], [0], [0], [1], [0, 0, 1, 1], [], []>} : vector<32x4xf32>, vector<4x256xf32>, vector<32x256xf32> -> vector<32x256xf32>
    %38 = arith.addf %29, %37 : vector<32x256xf32>
    %c4 = arith.constant 4 : index
    %c0_27 = arith.constant 0 : index
    %c0_28 = arith.constant 0 : index
    %39 = vector.load %arg3[%c4, %c0_27, %c0_28] : memref<9x32x4xf32, #tpu.memory_space<vmem>>, vector<1x32x4xf32>
    %40 = vector.shape_cast %39 : vector<1x32x4xf32> to vector<32x4xf32>
    %cst_29 = arith.constant dense<0.000000e+00> : vector<32x256xf32>
    %41 = tpu.matmul %40, %1, %cst_29 {dimension_numbers = #tpu.dot_dimension_numbers<[1], [0], [0], [1], [0, 0, 1, 1], [], []>} : vector<32x4xf32>, vector<4x256xf32>, vector<32x256xf32> -> vector<32x256xf32>
    %42 = arith.addf %38, %41 : vector<32x256xf32>
    %c255_i32 = arith.constant 255 : i32
    %43 = tpu.dynamic_rotate %1 by %c255_i32 dim 1 : vector<4x256xf32>, i32 -> vector<4x256xf32>
    %c5 = arith.constant 5 : index
    %c0_30 = arith.constant 0 : index
    %c0_31 = arith.constant 0 : index
    %44 = vector.load %arg2[%c5, %c0_30, %c0_31] : memref<9x1x256xf32, #tpu.memory_space<vmem>>, vector<1x1x256xf32>
    %45 = vector.shape_cast %44 : vector<1x1x256xf32> to vector<1x256xf32>
    %46 = vector.broadcast %45 : vector<1x256xf32> to vector<4x256xf32>
    %47 = arith.mulf %43, %46 : vector<4x256xf32>
    %c5_32 = arith.constant 5 : index
    %c0_33 = arith.constant 0 : index
    %c0_34 = arith.constant 0 : index
    %48 = vector.load %arg3[%c5_32, %c0_33, %c0_34] : memref<9x32x4xf32, #tpu.memory_space<vmem>>, vector<1x32x4xf32>
    %49 = vector.shape_cast %48 : vector<1x32x4xf32> to vector<32x4xf32>
    %cst_35 = arith.constant dense<0.000000e+00> : vector<32x256xf32>
    %50 = tpu.matmul %49, %47, %cst_35 {dimension_numbers = #tpu.dot_dimension_numbers<[1], [0], [0], [1], [0, 0, 1, 1], [], []>} : vector<32x4xf32>, vector<4x256xf32>, vector<32x256xf32> -> vector<32x256xf32>
    %51 = arith.addf %42, %50 : vector<32x256xf32>
    %c241_i32 = arith.constant 241 : i32
    %52 = tpu.dynamic_rotate %1 by %c241_i32 dim 1 : vector<4x256xf32>, i32 -> vector<4x256xf32>
    %c6 = arith.constant 6 : index
    %c0_36 = arith.constant 0 : index
    %c0_37 = arith.constant 0 : index
    %53 = vector.load %arg2[%c6, %c0_36, %c0_37] : memref<9x1x256xf32, #tpu.memory_space<vmem>>, vector<1x1x256xf32>
    %54 = vector.shape_cast %53 : vector<1x1x256xf32> to vector<1x256xf32>
    %55 = vector.broadcast %54 : vector<1x256xf32> to vector<4x256xf32>
    %56 = arith.mulf %52, %55 : vector<4x256xf32>
    %c6_38 = arith.constant 6 : index
    %c0_39 = arith.constant 0 : index
    %c0_40 = arith.constant 0 : index
    %57 = vector.load %arg3[%c6_38, %c0_39, %c0_40] : memref<9x32x4xf32, #tpu.memory_space<vmem>>, vector<1x32x4xf32>
    %58 = vector.shape_cast %57 : vector<1x32x4xf32> to vector<32x4xf32>
    %cst_41 = arith.constant dense<0.000000e+00> : vector<32x256xf32>
    %59 = tpu.matmul %58, %56, %cst_41 {dimension_numbers = #tpu.dot_dimension_numbers<[1], [0], [0], [1], [0, 0, 1, 1], [], []>} : vector<32x4xf32>, vector<4x256xf32>, vector<32x256xf32> -> vector<32x256xf32>
    %60 = arith.addf %51, %59 : vector<32x256xf32>
    %c240_i32 = arith.constant 240 : i32
    %61 = tpu.dynamic_rotate %1 by %c240_i32 dim 1 : vector<4x256xf32>, i32 -> vector<4x256xf32>
    %c7 = arith.constant 7 : index
    %c0_42 = arith.constant 0 : index
    %c0_43 = arith.constant 0 : index
    %62 = vector.load %arg2[%c7, %c0_42, %c0_43] : memref<9x1x256xf32, #tpu.memory_space<vmem>>, vector<1x1x256xf32>
    %63 = vector.shape_cast %62 : vector<1x1x256xf32> to vector<1x256xf32>
    %64 = vector.broadcast %63 : vector<1x256xf32> to vector<4x256xf32>
    %65 = arith.mulf %61, %64 : vector<4x256xf32>
    %c7_44 = arith.constant 7 : index
    %c0_45 = arith.constant 0 : index
    %c0_46 = arith.constant 0 : index
    %66 = vector.load %arg3[%c7_44, %c0_45, %c0_46] : memref<9x32x4xf32, #tpu.memory_space<vmem>>, vector<1x32x4xf32>
    %67 = vector.shape_cast %66 : vector<1x32x4xf32> to vector<32x4xf32>
    %cst_47 = arith.constant dense<0.000000e+00> : vector<32x256xf32>
    %68 = tpu.matmul %67, %65, %cst_47 {dimension_numbers = #tpu.dot_dimension_numbers<[1], [0], [0], [1], [0, 0, 1, 1], [], []>} : vector<32x4xf32>, vector<4x256xf32>, vector<32x256xf32> -> vector<32x256xf32>
    %69 = arith.addf %60, %68 : vector<32x256xf32>
    %c239_i32 = arith.constant 239 : i32
    %70 = tpu.dynamic_rotate %1 by %c239_i32 dim 1 : vector<4x256xf32>, i32 -> vector<4x256xf32>
    %c8 = arith.constant 8 : index
    %c0_48 = arith.constant 0 : index
    %c0_49 = arith.constant 0 : index
    %71 = vector.load %arg2[%c8, %c0_48, %c0_49] : memref<9x1x256xf32, #tpu.memory_space<vmem>>, vector<1x1x256xf32>
    %72 = vector.shape_cast %71 : vector<1x1x256xf32> to vector<1x256xf32>
    %73 = vector.broadcast %72 : vector<1x256xf32> to vector<4x256xf32>
    %74 = arith.mulf %70, %73 : vector<4x256xf32>
    %c8_50 = arith.constant 8 : index
    %c0_51 = arith.constant 0 : index
    %c0_52 = arith.constant 0 : index
    %75 = vector.load %arg3[%c8_50, %c0_51, %c0_52] : memref<9x32x4xf32, #tpu.memory_space<vmem>>, vector<1x32x4xf32>
    %76 = vector.shape_cast %75 : vector<1x32x4xf32> to vector<32x4xf32>
    %cst_53 = arith.constant dense<0.000000e+00> : vector<32x256xf32>
    %77 = tpu.matmul %76, %74, %cst_53 {dimension_numbers = #tpu.dot_dimension_numbers<[1], [0], [0], [1], [0, 0, 1, 1], [], []>} : vector<32x4xf32>, vector<4x256xf32>, vector<32x256xf32> -> vector<32x256xf32>
    %78 = arith.addf %69, %77 : vector<32x256xf32>
    %c0_54 = arith.constant 0 : index
    %c0_55 = arith.constant 0 : index
    %79 = vector.load %arg4[%c0_54, %c0_55] : memref<32x1xf32, #tpu.memory_space<vmem>>, vector<32x1xf32>
    %80 = vector.broadcast %79 : vector<32x1xf32> to vector<32x256xf32>
    %81 = arith.mulf %78, %80 : vector<32x256xf32>
    %c0_56 = arith.constant 0 : index
    %c0_57 = arith.constant 0 : index
    %82 = vector.load %arg5[%c0_56, %c0_57] : memref<32x1xf32, #tpu.memory_space<vmem>>, vector<32x1xf32>
    %83 = vector.broadcast %82 : vector<32x1xf32> to vector<32x256xf32>
    %84 = arith.addf %81, %83 : vector<32x256xf32>
    %cst_58 = arith.constant 0.000000e+00 : f32
    %85 = vector.broadcast %cst_58 : f32 to vector<32x256xf32>
    %86 = arith.maximumf %84, %85 : vector<32x256xf32>
    %c0_59 = arith.constant 0 : index
    %c0_60 = arith.constant 0 : index
    %87 = vector.load %arg6[%c0_59, %c0_60] : memref<8x32xf32, #tpu.memory_space<vmem>>, vector<8x32xf32>
    %cst_61 = arith.constant dense<0.000000e+00> : vector<8x256xf32>
    %88 = tpu.matmul %87, %86, %cst_61 {dimension_numbers = #tpu.dot_dimension_numbers<[1], [0], [0], [1], [0, 0, 1, 1], [], []>} : vector<8x32xf32>, vector<32x256xf32>, vector<8x256xf32> -> vector<8x256xf32>
    %c0_62 = arith.constant 0 : index
    %c0_63 = arith.constant 0 : index
    %c0_64 = arith.constant 0 : index
    %89 = vector.load %arg7[%c0_62, %c0_63, %c0_64] : memref<1x8x256xf32, #tpu.memory_space<vmem>>, vector<1x8x256xf32>
    %90 = vector.shape_cast %89 : vector<1x8x256xf32> to vector<8x256xf32>
    %91 = vector.shape_cast %88 : vector<8x256xf32> to vector<1x8x256xf32>
    tpu.vector_store %arg7[%c0_62, %c0_63, %c0_64], %91 {strides = array<i32>} : memref<1x8x256xf32, #tpu.memory_space<vmem>>, vector<1x8x256xf32>,
    return
  }
  func.func @transform_0(%arg0: i32) -> (i32, i32, i32) {
    %c0_i32 = arith.constant 0 : i32
    %c0_i32_0 = arith.constant 0 : i32
    %c0_i32_1 = arith.constant 0 : i32
    return %arg0, %c0_i32, %c0_i32_0 : i32, i32, i32
  }
  func.func @transform_1(%arg0: i32) -> (i32, i32, i32) {
    %c0_i32 = arith.constant 0 : i32
    %c0_i32_0 = arith.constant 0 : i32
    %c0_i32_1 = arith.constant 0 : i32
    %c0_i32_2 = arith.constant 0 : i32
    return %c0_i32, %c0_i32_0, %c0_i32_1 : i32, i32, i32
  }
  func.func @transform_2(%arg0: i32) -> (i32, i32, i32) {
    %c0_i32 = arith.constant 0 : i32
    %c0_i32_0 = arith.constant 0 : i32
    %c0_i32_1 = arith.constant 0 : i32
    %c0_i32_2 = arith.constant 0 : i32
    return %c0_i32, %c0_i32_0, %c0_i32_1 : i32, i32, i32
  }
  func.func @transform_3(%arg0: i32) -> (i32, i32) {
    %c0_i32 = arith.constant 0 : i32
    %c0_i32_0 = arith.constant 0 : i32
    %c0_i32_1 = arith.constant 0 : i32
    return %c0_i32, %c0_i32_0 : i32, i32
  }
  func.func @transform_4(%arg0: i32) -> (i32, i32) {
    %c0_i32 = arith.constant 0 : i32
    %c0_i32_0 = arith.constant 0 : i32
    %c0_i32_1 = arith.constant 0 : i32
    return %c0_i32, %c0_i32_0 : i32, i32
  }
  func.func @transform_5(%arg0: i32) -> (i32, i32) {
    %c0_i32 = arith.constant 0 : i32
    %c0_i32_0 = arith.constant 0 : i32
    %c0_i32_1 = arith.constant 0 : i32
    return %c0_i32, %c0_i32_0 : i32, i32
  }
  func.func @transform_6(%arg0: i32) -> (i32, i32, i32) {
    %c0_i32 = arith.constant 0 : i32
    %c0_i32_0 = arith.constant 0 : i32
    %c0_i32_1 = arith.constant 0 : i32
    return %arg0, %c0_i32, %c0_i32_0 : i32, i32, i32
  }
}

</mosaic_0001>

<bundles_post_ra>
// kernel: bisenet_output.1
= control target key start
LH: loop header
LB: loop body
LE: loop exit
PB: predicated region body
PF: predicated region fallthrough
CT: control target
= control target key end

     0   :  { %s1602_s21 = smov 0   ;;  %s1893_s0 = inlined_call_operand.vmem [shape: f32[2,4,256], index: 0, kind: input, shape index: {}]   ;;  %s1894_s1 = inlined_call_operand.vmem [shape: f32[9,1,256], index: 1, kind: input, shape index: {}]   ;;  %s1895_s2 = inlined_call_operand.vmem [shape: f32[9,32,4], index: 2, kind: input, shape index: {}]   ;;  %s1896_s3 = inlined_call_operand.vmem [shape: f32[32,1], index: 3, kind: input, shape index: {}]   ;;  %s1897_s4 = inlined_call_operand.vmem [shape: f32[32,1], index: 4, kind: input, shape index: {}]   ;;  %s1898_s5 = inlined_call_operand.vmem [shape: f32[8,32], index: 5, kind: input, shape index: {}]   ;;  %s1899_s6 = inlined_call_operand.vmem [shape: f32[2,8,256], index: 6, kind: output, shape index: {}]  }
   0x1 LB: > { %s1384_s22 = sadd.s32 4294967295, %s1556_s21   ;;  %p1388_p0 = scmp.ge.s32.totalorder %s1556_s21, 1  ;;  %s1556_s21 = sphi %s1602_s21, %s16_s21  }
   0x2   : > { %p212_p1 = scmp.lt.s32.totalorder %s1556_s21, 3 }
   0x4   : > { %p213_p2 = pnand %p1388_p0, %p212_p1 }
   0x5   : > { %p242_p3 = scmp.lt.s32.totalorder (!%p213_p2), %s1384_s22, 1  ;;  %s1558_s27 = smov (!%p213_p2), 17  }
   0x6   : > { %216 = sbr.rel (%p213_p2) target bundleno = 578 (0x242), region = 44  ;;  %s1559_s28 = smov (!%p213_p2), 16  }
   0x7   : > { %s1560_s29 = smov (!%p213_p2), 15   ;;  %s1561_s30 = smov (!%p213_p2), 1  }
   0x8   : > { %s1562_s7 = smov (!%p213_p2), 127   ;;  %s1563_s8 = smov (!%p213_p2), 113  }
   0x9   : > { %s1564_s9 = smov (!%p213_p2), 112   ;;  %s1565_s10 = smov (!%p213_p2), 111  }
   0xb   : > { %s1901_s22 = smov (!%p242_p3, %s1384_s22), 1  ;;  %v263_v20 = vlaneseq  ;;  %v1393_v24 = vld [vmem:[%s1894_s1 + $0x2] sm:$0x3]  ;;  %v268_v25 = vld [vmem:[%s1894_s1] sm:$0x3]  ;;  %vm319_vm2 = vcmask 1043456  }
   0xc   : > { %s1526_s23 = sshll.u32 %s1901_s22, 3  ;;  %v1418_v26 = vld [vmem:[%s1894_s1 + $0x4] sm:$0x3]  ;;  %v295_v27 = vperm.slane %v1393_v24, 0  ;;  %v296_v28 = vperm.slane %v1393_v24, 1  ;;  %v270_v32 = vperm.slane %v268_v25, 0 }
   0xd   : > { %s246_s26 = scalar_lea.vmem %s1893_s0, %s1526_s23  ;;  %v1620_v23 = vand.u32 127, %v263_v20  ;;  %v271_v33 = vperm.slane %v268_v25, 1  ;;  %v475_v34 = vperm.slane %v1418_v26, 0  ;;  %v476_v35 = vperm.slane %v1418_v26, 1  ;;  %v1394_v44 = vld [vmem:[%s1895_s2 + $0x20] sm:$0xff]  ;;  %v1397_v45 = vld [vmem:[%s1895_s2 + $0x38] sm:$0xff] }
   0xe   : > { %v252_v0 = vld [vmem:[%s246_s26] sm:$0xff]  ;;  %vm306_vm4 = vcmask 31744   ;;  %v1395_v57 = vld [vmem:[%s1895_s2 + $0x28] sm:$0xff]  ;;  %v1396_v61 = vld [vmem:[%s1895_s2 + $0x30] sm:$0xff]  ;;  %vm1283_vm10 = vcmask 261120  }
   0xf   : > { %254 = vst [vmem:[#allocation1] ss:$2 sm:$0xff] %v252_v0  ;;  %vm289_vm0 = vcmp.lt.s32.totalorder %v1620_v23, 16  ;;  %vm265_vm1 = vcmp.lt.s32.totalorder %v1620_v23, 17  ;;  %vm469_vm3 = vcmp.lt.s32.totalorder %v1620_v23, 15  ;;  %vm579_vm5 = vcmp.lt.s32.totalorder %v1620_v23, 1 }
  0x10   : > { %v1433_v50 = vld [vmem:[%s1894_s1 + $0x6] sm:$0x3]  ;;  %v277_v62 = vld [vmem:[%s1895_s2 + $0x8] sm:$0xff]  ;;  %v278_v63 = vld [vmem:[%s1895_s2 + $0x10] sm:$0xff]  ;;  %vm779_vm6 = vcmp.lt.s32.totalorder %v1620_v23, 127  ;;  %vm889_vm7 = vcmp.lt.s32.totalorder %v1620_v23, 113 }
  0x11   : > { %v585_v52 = vperm.slane %v1433_v50, 0  ;;  %v586_v53 = vperm.slane %v1433_v50, 1  ;;  %v276_v58 = vld [vmem:[%s1895_s2] sm:$0xff]  ;;  %v1422_v24 = vld [vmem:[%s1895_s2 + $0x58] sm:$0xff]  ;;  %v1435_v25 = vld [vmem:[%s1895_s2 + $0x68] sm:$0xff]  ;;  %vm999_vm8 = vcmp.lt.s32.totalorder %v1620_v23, 112 }
  0x12   : > { %v1436_v26 = vld [vmem:[%s1895_s2 + $0x70] sm:$0xff]  ;;  %vm1109_vm9 = vcmp.lt.s32.totalorder %v1620_v23, 111 }
  0x16   : > { %v255_v1 = vld.sshfl [vmem:[#allocation1] sm:$0xff pattern:$0x75316420]  ;;  %v256_v2 = vld.sshfl [vmem:[#allocation1 + $0x8] sm:$0xff pattern:$0x75316420] }
  0x17   : > { %280 = vst [vmem:[#allocation1] ss:$2 sm:$0xff] %v252_v0  ;;  %259 = vrot.lane.b32.xlu1 %v255_v1, %s1558_s27  ;;  %v279_v1 = vld [vmem:[%s1895_s2 + $0x18] sm:$0xff] }
  0x1e   : > { %v281_v3 = vld.sshfl [vmem:[#allocation1] sm:$0xff pattern:$0x75316420]  ;;  %v282_v4 = vld.sshfl [vmem:[#allocation1 + $0x8] sm:$0xff pattern:$0x75316420] }
  0x1f   : > { %285 = vrot.lane.b32.xlu0 %v281_v3, %s1559_s28  ;;  %460 = vst [vmem:[#allocation1] ss:$2 sm:$0xff] %v252_v0  ;;  %261 = vrot.lane.b32.xlu1 %v256_v2, %s1558_s27  ;;  %v1420_v2 = vld [vmem:[%s1895_s2 + $0x48] sm:$0xff] }
  0x26   : > { %v461_v5 = vld.sshfl [vmem:[#allocation1] sm:$0xff pattern:$0x75316420]  ;;  %v462_v6 = vld.sshfl [vmem:[#allocation1 + $0x8] sm:$0xff pattern:$0x75316420] }
  0x27   : > { %287 = vrot.lane.b32.xlu0 %v282_v4, %s1559_s28  ;;  %465 = vrot.lane.b32.xlu2 %v461_v5, %s1560_s29  ;;  %570 = vst [vmem:[#allocation1] ss:$2 sm:$0xff] %v252_v0  ;;  %v1462_v4 = vld [vmem:[%s1894_s1 + $0xa] sm:$0x3] }
  0x2e   : > { %v572_v7 = vld.sshfl [vmem:[#allocation1 + $0x8] sm:$0xff pattern:$0x75316420]  ;;  %v571_v8 = vld.sshfl [vmem:[#allocation1] sm:$0xff pattern:$0x75316420] }
  0x2f   : > { %467 = vrot.lane.b32.xlu2 %v462_v6, %s1560_s29  ;;  %577 = vrot.lane.b32.xlu1 %v572_v7, %s1561_s30  ;;  %685 = vst [vmem:[#allocation1] ss:$2 sm:$0xff] %v252_v0  ;;  %v785_v6 = vperm.slane %v1462_v4, 0  ;;  %v786_v7 = vperm.slane %v1462_v4, 1 }
  0x30   : > { %575 = vrot.lane.b32.xlu0 %v571_v8, %s1561_s30 }
  0x36   : > { %v1616_v9 = vld.sshfl [vmem:[#allocation1] sm:$0xff pattern:$0x75316420]  ;;  %v1618_v10 = vld.sshfl [vmem:[#allocation1 + $0x8] sm:$0xff pattern:$0x75316420] }
  0x37   : > { %770 = vst [vmem:[#allocation1] ss:$2 sm:$0xff] %v252_v0 }
  0x3e   : > { %v772_v11 = vld.sshfl [vmem:[#allocation1 + $0x8] sm:$0xff pattern:$0x75316420]  ;;  %v771_v12 = vld.sshfl [vmem:[#allocation1] sm:$0xff pattern:$0x75316420] }
  0x3f   : > { %777 = vrot.lane.b32.xlu0 %v772_v11, %s1562_s7  ;;  %880 = vst [vmem:[#allocation1] ss:$2 sm:$0xff] %v252_v0  ;;  %775 = vrot.lane.b32.xlu2 %v771_v12, %s1562_s7  ;;  %v1421_v12 = vld [vmem:[%s1895_s2 + $0x50] sm:$0xff]  ;;  %s1527_s7 = sshll.u32 %s1901_s22, 4 }
  0x46   : > { %v881_v13 = vld.sshfl [vmem:[#allocation1] sm:$0xff pattern:$0x75316420]  ;;  %v882_v14 = vld.sshfl [vmem:[#allocation1 + $0x8] sm:$0xff pattern:$0x75316420] }
  0x47   : > { %885 = vrot.lane.b32.xlu1 %v881_v13, %s1563_s8  ;;  %990 = vst [vmem:[#allocation1] ss:$2 sm:$0xff] %v252_v0  ;;  %887 = vrot.lane.b32.xlu2 %v882_v14, %s1563_s8  ;;  %v1434_v13 = vld [vmem:[%s1895_s2 + $0x60] sm:$0xff] }
  0x4e   : > { %v992_v15 = vld.sshfl [vmem:[#allocation1 + $0x8] sm:$0xff pattern:$0x75316420]  ;;  %v991_v16 = vld.sshfl [vmem:[#allocation1] sm:$0xff pattern:$0x75316420] }
  0x4f   : > { %997 = vrot.lane.b32.xlu1 %v992_v15, %s1564_s9  ;;  %995 = vrot.lane.b32.xlu0 %v991_v16, %s1564_s9  ;;  %1100 = vst [vmem:[#allocation1] ss:$2 sm:$0xff] %v252_v0  ;;  %v1419_v0 = vld [vmem:[%s1895_s2 + $0x40] sm:$0xff]  ;;  %v1477_v15 = vld [vmem:[%s1894_s1 + $0xc] sm:$0x3] }
  0x56   : > { %v1102_v17 = vld.sshfl [vmem:[#allocation1 + $0x8] sm:$0xff pattern:$0x75316420]  ;;  %v1101_v21 = vld.sshfl [vmem:[#allocation1] sm:$0xff pattern:$0x75316420] }
  0x57   : > { %1107 = vrot.lane.b32.xlu0 %v1102_v17, %s1565_s10  ;;  %1105 = vrot.lane.b32.xlu2 %v1101_v21, %s1565_s10  ;;  %v895_v17 = vperm.slane %v1477_v15, 0  ;;  %s251_s10 = scalar_lea.vmem %s1899_s6, %s1527_s7 }
  0x81   : > { %v466_v19 = vpop.permute.xlu2 %465 }
  0x89   : > { %v260_v18 = vpop.permute.xlu1 %259  ;;  %v468_v30 = vpop.permute.xlu2 %467 }
  0x8a   : > { %v470_v42 = vsel %vm469_vm3, %v466_v19, %v468_v30  ;;  %v471_v43 = vsel %vm469_vm3, %v468_v30, %v466_v19 }
  0x8b   : > { %v479_v48 = vmul.f32 %v475_v34, %v471_v43  ;;  %v480_v49 = vmul.f32 %v476_v35, %v470_v42 }
  0x91   : > { %v286_v22 = vpop.permute.xlu0 %285  ;;  %v262_v29 = vpop.permute.xlu1 %261 }
  0x92   : > { %v266_v38 = vsel %vm265_vm1, %v260_v18, %v262_v29  ;;  %v267_v39 = vsel %vm265_vm1, %v262_v29, %v260_v18  ;;  %v896_v18 = vperm.slane %v1477_v15, 1  ;;  %v1449_v29 = vld [vmem:[%s1895_s2 + $0x88] sm:$0xff] }
  0x93   : > { %v274_v46 = vmul.f32 %v270_v32, %v267_v39  ;;  %v275_v47 = vmul.f32 %v271_v33, %v266_v38  ;;  %v1450_v39 = vld [vmem:[%s1895_s2 + $0x90] sm:$0xff] }
  0x99   : > { %v288_v31 = vpop.permute.xlu0 %287  ;;  %v776_v5 = vpop.permute.xlu2 %775 }
  0x9a   : > { %v290_v36 = vsel %vm289_vm0, %v286_v22, %v288_v31  ;;  %v291_v37 = vsel %vm289_vm0, %v288_v31, %v286_v22  ;;  %v1492_v31 = vld [vmem:[%s1894_s1 + $0xe] sm:$0x3] }
  0x9b   : > { %v299_v40 = vmul.f32 %v295_v27, %v291_v37  ;;  %v300_v41 = vmul.f32 %v296_v28, %v290_v36  ;;  %v1448_v27 = vld [vmem:[%s1895_s2 + $0x80] sm:$0xff]  ;;  %v1437_v28 = vld [vmem:[%s1895_s2 + $0x78] sm:$0xff]  ;;  %v1005_v33 = vperm.slane %v1492_v31, 0  ;;  %v1006_v34 = vperm.slane %v1492_v31, 1 }
  0x9d   : > { %1398 = vmatpush.msk.msra.mxu0 %vm319_vm2, %v299_v40  ;;  %1528 = vmatpush.msk.msra.mxu2 %vm319_vm2, %v299_v40  ;;  %v1463_v40 = vld [vmem:[%s1895_s2 + $0xa0] sm:$0xff] }
  0x9e   : > { %1403 = vmatpush.msk.msra.mxu1 %vm319_vm2, %v300_v41  ;;  %1529 = vmatpush.msk.msra.mxu3 %vm319_vm2, %v300_v41  ;;  %v1507_v41 = vld [vmem:[%s1894_s1 + $0x10] sm:$0x3] }
  0x9f   : > { %1399 = vmatmul.msk.f32.vlgmr.msra.gmra.mxu0 %vm306_vm4, %v1394_v44  ;;  %1402 = vmatmul.msk.f32.vlgmr.msra.gmra.mxu2 %vm306_vm4, %v1397_v45  ;;  %v1115_v42 = vperm.slane %v1507_v41, 0  ;;  %v1116_v43 = vperm.slane %v1507_v41, 1 }
  0xa0   : > { %1404 = vmatmul.msk.f32.vlgmr.msra.gmra.mxu1 %vm306_vm4, %v1394_v44  ;;  %1407 = vmatmul.msk.f32.vlgmr.msra.gmra.mxu3 %vm306_vm4, %v1397_v45  ;;  %v1451_v45 = vld [vmem:[%s1895_s2 + $0x98] sm:$0xff] }
  0xa1   : > { %1408 = vmatpush.msk.msrb.mxu2 %vm319_vm2, %v274_v46  ;;  %1413 = vmatpush.msk.msrb.mxu3 %vm319_vm2, %v275_v47  ;;  %v578_v51 = vpop.permute.xlu1 %577  ;;  %v888_v14 = vpop.permute.xlu2 %887  ;;  %v1464_v46 = vld [vmem:[%s1895_s2 + $0xa8] sm:$0xff] }
  0xa2   : > { %1423 = vmatpush.msk.msrb.mxu0 %vm319_vm2, %v479_v48  ;;  %1428 = vmatpush.msk.msrb.mxu1 %vm319_vm2, %v480_v49  ;;  %v576_v54 = vpop.permute.xlu0 %575 }
  0xa3   : > { %v580_v55 = vsel %vm579_vm5, %v576_v54, %v578_v51  ;;  %v581_v56 = vsel %vm579_vm5, %v578_v51, %v576_v54  ;;  %v1213_v51 = vld [vmem:[%s1896_s3 + $0x18] sm:$0xff]  ;;  %v1478_v54 = vld [vmem:[%s1895_s2 + $0xc0] sm:$0xff] }
  0xa4   : > { %1452 = vmatpush.msk.msra.mxu0 %vm319_vm2, %v1616_v9  ;;  %1457 = vmatpush.msk.msra.mxu1 %vm319_vm2, %v1618_v10  ;;  %v589_v59 = vmul.f32 %v585_v52, %v581_v56  ;;  %v590_v60 = vmul.f32 %v586_v53, %v580_v55  ;;  %v1566_v52 = vmov 0   ;;  %v1465_v53 = vld [vmem:[%s1895_s2 + $0xb0] sm:$0xff]  ;;  %v1466_v55 = vld [vmem:[%s1895_s2 + $0xb8] sm:$0xff]  ;;  %v1479_v56 = vld [vmem:[%s1895_s2 + $0xc8] sm:$0xff] }
  0xa5   : > { %1547 = vset.pattern.permute.xlu1 %v1566_v52  ;;  %1549 = vset.pattern.permute.xlu0 %v1566_v52 }
  0xa6   : > { %1438 = vmatpush.msk.msra.mxu2 %vm319_vm2, %v589_v59  ;;  %1443 = vmatpush.msk.msra.mxu3 %vm319_vm2, %v590_v60  ;;  %v1480_v59 = vld [vmem:[%s1895_s2 + $0xd0] sm:$0xff]  ;;  %v1493_v60 = vld [vmem:[%s1895_s2 + $0xe0] sm:$0xff] }
  0xa7   : > { %1400 = vmatmul.msk.f32.gmra.mxu0 %vm306_vm4, %v1395_v57  ;;  %1409 = vmatmul.msk.f32.vlgmr.msrb.gmra.mxu2 %vm306_vm4, %v276_v58 }
  0xa8   : > { %1405 = vmatmul.msk.f32.gmra.mxu1 %vm306_vm4, %v1395_v57  ;;  %1414 = vmatmul.msk.f32.vlgmr.msrb.gmra.mxu3 %vm306_vm4, %v276_v58  ;;  %v1211_v57 = vld [vmem:[%s1896_s3 + $0x8] sm:$0xff]  ;;  %v1245_v58 = vld [vmem:[%s1897_s4 + $0x18] sm:$0xff] }
  0xa9   : > { %1231 = vperm.xlu1 %1547, %v1213_v51   ;;  %1548 = vset.pattern.permute.xlu2 %v1566_v52 }
  0xaa   : > { %1263 = vperm.xlu0 %1549, %v1245_v58  }
  0xaf   : > { %1401 = vmatmul.msk.f32.gmra.mxu0 %vm306_vm4, %v1396_v61  ;;  %1410 = vmatmul.msk.f32.gmra.mxu2 %vm306_vm4, %v277_v62 }
  0xb0   : > { %1406 = vmatmul.msk.f32.gmra.mxu1 %vm306_vm4, %v1396_v61  ;;  %1415 = vmatmul.msk.f32.gmra.mxu3 %vm306_vm4, %v277_v62  ;;  %v1210_v61 = vld [vmem:[%s1896_s3] sm:$0xff] }
  0xb1   : > { %v778_v3 = vpop.permute.xlu0 %777  ;;  %v1106_v44 = vpop.permute.xlu2 %1105  ;;  %1221 = vperm.xlu1 %1547, %v1211_v57   ;;  %v1242_v62 = vld [vmem:[%s1897_s4] sm:$0xff] }
  0xb2   : > { %v780_v8 = vsel %vm779_vm6, %v776_v5, %v778_v3  ;;  %v781_v9 = vsel %vm779_vm6, %v778_v3, %v776_v5  ;;  %1248 = vperm.xlu0 %1549, %v1242_v62   ;;  %v1212_v3 = vld [vmem:[%s1896_s3 + $0x10] sm:$0xff]  ;;  %v1496_v5 = vld [vmem:[%s1895_s2 + $0xf8] sm:$0xff] }
  0xb3   : > { %v789_v10 = vmul.f32 %v785_v6, %v780_v8  ;;  %v790_v11 = vmul.f32 %v786_v7, %v781_v9  ;;  %1226 = vperm.xlu2 %1548, %v1212_v3   ;;  %v1509_v6 = vld [vmem:[%s1895_s2 + $0x108] sm:$0xff]  ;;  %v1244_v8 = vld [vmem:[%s1897_s4 + $0x10] sm:$0xff] }
  0xb5   : > { %1467 = vmatpush.msk.msrb.mxu2 %vm319_vm2, %v789_v10  ;;  %1472 = vmatpush.msk.msrb.mxu3 %vm319_vm2, %v790_v11 }
  0xb7   : > { %1411 = vmatmul.msk.f32.gmra.mxu2 %vm306_vm4, %v278_v63  ;;  %1424 = vmatmul.msk.f32.vlgmr.msrb.gmra.mxu0 %vm306_vm4, %v1419_v0 }
  0xb8   : > { %1416 = vmatmul.msk.f32.gmra.mxu3 %vm306_vm4, %v278_v63  ;;  %1429 = vmatmul.msk.f32.vlgmr.msrb.gmra.mxu1 %vm306_vm4, %v1419_v0  ;;  %v1481_v63 = vld [vmem:[%s1895_s2 + $0xd8] sm:$0xff]  ;;  %v1494_v0 = vld [vmem:[%s1895_s2 + $0xe8] sm:$0xff] }
  0xb9   : > { %v886_v16 = vpop.permute.xlu1 %885  ;;  %1216 = vperm.xlu1 %1547, %v1210_v61  }
  0xba   : > { %v890_v19 = vsel %vm889_vm7, %v886_v16, %v888_v14  ;;  %v891_v20 = vsel %vm889_vm7, %v888_v14, %v886_v16  ;;  %v1243_v14 = vld [vmem:[%s1897_s4 + $0x8] sm:$0xff] }
  0xbb   : > { %v899_v21 = vmul.f32 %v895_v17, %v890_v19  ;;  %v900_v22 = vmul.f32 %v896_v18, %v891_v20  ;;  %1258 = vperm.xlu2 %1548, %v1244_v8   ;;  %v1511_v20 = vld [vmem:[%s1895_s2 + $0x118] sm:$0xff] }
  0xbd   : > { %1482 = vmatpush.msk.msrb.mxu0 %vm319_vm2, %v899_v21  ;;  %1487 = vmatpush.msk.msrb.mxu1 %vm319_vm2, %v900_v22 }
  0xbf   : > { %1412 = vmatmul.msk.f32.gmra.mxu2 %vm306_vm4, %v279_v1  ;;  %1425 = vmatmul.msk.f32.gmra.mxu0 %vm306_vm4, %v1420_v2 }
  0xc0   : > { %1417 = vmatmul.msk.f32.gmra.mxu3 %vm306_vm4, %v279_v1  ;;  %1430 = vmatmul.msk.f32.gmra.mxu1 %vm306_vm4, %v1420_v2  ;;  %v1495_v1 = vld [vmem:[%s1895_s2 + $0xf0] sm:$0xff]  ;;  %v1508_v2 = vld [vmem:[%s1895_s2 + $0x100] sm:$0xff] }
  0xc1   : > { %v998_v30 = vpop.permute.xlu1 %997  ;;  %v996_v32 = vpop.permute.xlu0 %995 }
  0xc2   : > { %v1000_v35 = vsel %vm999_vm8, %v996_v32, %v998_v30  ;;  %v1001_v36 = vsel %vm999_vm8, %v998_v30, %v996_v32 }
  0xc3   : > { %v1009_v37 = vmul.f32 %v1005_v33, %v1000_v35  ;;  %v1010_v38 = vmul.f32 %v1006_v34, %v1001_v36  ;;  %1253 = vperm.xlu2 %1548, %v1243_v14  }
  0xc7   : > { %1426 = vmatmul.msk.f32.gmra.mxu0 %vm306_vm4, %v1421_v12  ;;  %1439 = vmatmul.msk.f32.vlgmr.msra.gmra.mxu2 %vm306_vm4, %v1434_v13 }
  0xc8   : > { %1431 = vmatmul.msk.f32.gmra.mxu1 %vm306_vm4, %v1421_v12  ;;  %1444 = vmatmul.msk.f32.vlgmr.msra.gmra.mxu3 %vm306_vm4, %v1434_v13  ;;  %v1510_v12 = vld [vmem:[%s1895_s2 + $0x110] sm:$0xff] }
  0xc9   : > { %1497 = vmatpush.msk.msra.mxu2 %vm319_vm2, %v1009_v37  ;;  %1502 = vmatpush.msk.msra.mxu3 %vm319_vm2, %v1010_v38  ;;  %v1108_v47 = vpop.permute.xlu0 %1107 }
  0xca   : > { %v1110_v48 = vsel %vm1109_vm9, %v1106_v44, %v1108_v47  ;;  %v1111_v49 = vsel %vm1109_vm9, %v1108_v47, %v1106_v44 }
  0xcb   : > { %v1119_v50 = vmul.f32 %v1115_v42, %v1110_v48  ;;  %v1120_v23 = vmul.f32 %v1116_v43, %v1111_v49 }
  0xcf   : > { %1427 = vmatmul.msk.f32.gmra.mxu0 %vm306_vm4, %v1422_v24  ;;  %1440 = vmatmul.msk.f32.gmra.mxu2 %vm306_vm4, %v1435_v25 }
  0xd0   : > { %1432 = vmatmul.msk.f32.gmra.mxu1 %vm306_vm4, %v1422_v24  ;;  %1445 = vmatmul.msk.f32.gmra.mxu3 %vm306_vm4, %v1435_v25 }
  0xd7   : > { %1441 = vmatmul.msk.f32.gmra.mxu2 %vm306_vm4, %v1436_v26  ;;  %1453 = vmatmul.msk.f32.vlgmr.msra.gmra.mxu0 %vm306_vm4, %v1448_v27 }
  0xd8   : > { %1446 = vmatmul.msk.f32.gmra.mxu3 %vm306_vm4, %v1436_v26  ;;  %1458 = vmatmul.msk.f32.vlgmr.msra.gmra.mxu1 %vm306_vm4, %v1448_v27 }
  0xd9   : > { %1512 = vmatpush.msk.msra.mxu0 %vm319_vm2, %v1119_v50  ;;  %1517 = vmatpush.msk.msra.mxu1 %vm319_vm2, %v1120_v23 }
  0xdf   : > { %1442 = vmatmul.msk.f32.gmra.mxu2 %vm306_vm4, %v1437_v28  ;;  %1454 = vmatmul.msk.f32.gmra.mxu0 %vm306_vm4, %v1449_v29 }
  0xe0   : > { %1447 = vmatmul.msk.f32.gmra.mxu3 %vm306_vm4, %v1437_v28  ;;  %1459 = vmatmul.msk.f32.gmra.mxu1 %vm306_vm4, %v1449_v29 }
  0xe7   : > { %1455 = vmatmul.msk.f32.gmra.mxu0 %vm306_vm4, %v1450_v39  ;;  %1468 = vmatmul.msk.f32.vlgmr.msrb.gmra.mxu2 %vm306_vm4, %v1463_v40 }
  0xe8   : > { %1460 = vmatmul.msk.f32.gmra.mxu1 %vm306_vm4, %v1450_v39  ;;  %1473 = vmatmul.msk.f32.vlgmr.msrb.gmra.mxu3 %vm306_vm4, %v1463_v40 }
  0xef   : > { %1456 = vmatmul.msk.f32.gmra.mxu0 %vm306_vm4, %v1451_v45  ;;  %1469 = vmatmul.msk.f32.gmra.mxu2 %vm306_vm4, %v1464_v46 }
  0xf0   : > { %1461 = vmatmul.msk.f32.gmra.mxu1 %vm306_vm4, %v1451_v45  ;;  %1474 = vmatmul.msk.f32.gmra.mxu3 %vm306_vm4, %v1464_v46 }
  0xf7   : > { %1470 = vmatmul.msk.f32.gmra.mxu2 %vm306_vm4, %v1465_v53  ;;  %1483 = vmatmul.msk.f32.vlgmr.msrb.gmra.mxu0 %vm306_vm4, %v1478_v54 }
  0xf8   : > { %1475 = vmatmul.msk.f32.gmra.mxu3 %vm306_vm4, %v1465_v53  ;;  %1488 = vmatmul.msk.f32.vlgmr.msrb.gmra.mxu1 %vm306_vm4, %v1478_v54 }
  0xff   : > { %1471 = vmatmul.msk.f32.gmra.mxu2 %vm306_vm4, %v1466_v55  ;;  %1484 = vmatmul.msk.f32.gmra.mxu0 %vm306_vm4, %v1479_v56 }
 0x100   : > { %1476 = vmatmul.msk.f32.gmra.mxu3 %vm306_vm4, %v1466_v55  ;;  %1489 = vmatmul.msk.f32.gmra.mxu1 %vm306_vm4, %v1479_v56 }
 0x107   : > { %1485 = vmatmul.msk.f32.gmra.mxu0 %vm306_vm4, %v1480_v59  ;;  %1498 = vmatmul.msk.f32.vlgmr.msra.gmra.mxu2 %vm306_vm4, %v1493_v60 }
 0x108   : > { %1490 = vmatmul.msk.f32.gmra.mxu1 %vm306_vm4, %v1480_v59  ;;  %1503 = vmatmul.msk.f32.vlgmr.msra.gmra.mxu3 %vm306_vm4, %v1493_v60 }
 0x10f   : > { %1486 = vmatmul.msk.f32.gmra.mxu0 %vm306_vm4, %v1481_v63  ;;  %1499 = vmatmul.msk.f32.gmra.mxu2 %vm306_vm4, %v1494_v0 }
 0x110   : > { %1491 = vmatmul.msk.f32.gmra.mxu1 %vm306_vm4, %v1481_v63  ;;  %1504 = vmatmul.msk.f32.gmra.mxu3 %vm306_vm4, %v1494_v0 }
 0x117   : > { %1500 = vmatmul.msk.f32.gmra.mxu2 %vm306_vm4, %v1495_v1  ;;  %1513 = vmatmul.msk.f32.vlgmr.msra.gmra.mxu0 %vm306_vm4, %v1508_v2 }
 0x118   : > { %1505 = vmatmul.msk.f32.gmra.mxu3 %vm306_vm4, %v1495_v1  ;;  %1518 = vmatmul.msk.f32.vlgmr.msra.gmra.mxu1 %vm306_vm4, %v1508_v2 }
 0x11c   : > { %v343_v4 = vpop.f32.mrf.mxu0 }
 0x11d   : > { %v372_v7 = vpop.f32.mrf.mxu1 }
 0x11f   : > { %1501 = vmatmul.msk.f32.gmra.mxu2 %vm306_vm4, %v1496_v5  ;;  %1514 = vmatmul.msk.f32.gmra.mxu0 %vm306_vm4, %v1509_v6 }
 0x120   : > { %1506 = vmatmul.msk.f32.gmra.mxu3 %vm306_vm4, %v1496_v5  ;;  %1519 = vmatmul.msk.f32.gmra.mxu1 %vm306_vm4, %v1509_v6 }
 0x122   : > { %v352_v9 = vpop.f32.mrf.mxu2 }
 0x123   : > { %v381_v10 = vpop.f32.mrf.mxu3 }
 0x124   : > { %v346_v11 = vpop.f32.mrf.mxu0 }
 0x125   : > { %v375_v13 = vpop.f32.mrf.mxu1 }
 0x127   : > { %1515 = vmatmul.msk.f32.gmra.mxu0 %vm306_vm4, %v1510_v12 }
 0x128   : > { %1520 = vmatmul.msk.f32.gmra.mxu1 %vm306_vm4, %v1510_v12 }
 0x12a   : > { %v419_v15 = vpop.f32.mrf.mxu2 }
 0x12b   : > { %v420_v16 = vadd.f32 %v419_v15, %v343_v4  ;;  %v448_v17 = vpop.f32.mrf.mxu3 }
 0x12c   : > { %v449_v18 = vadd.f32 %v448_v17, %v372_v7  ;;  %v349_v19 = vpop.f32.mrf.mxu0 }
 0x12d   : > { %v378_v21 = vpop.f32.mrf.mxu1 }
 0x12f   : > { %1516 = vmatmul.msk.f32.gmra.mxu0 %vm306_vm4, %v1511_v20 }
 0x130   : > { %1521 = vmatmul.msk.f32.gmra.mxu1 %vm306_vm4, %v1511_v20 }
 0x132   : > { %v422_v22 = vpop.f32.mrf.mxu2 }
 0x133   : > { %v423_v24 = vadd.f32 %v422_v22, %v346_v11  ;;  %v451_v25 = vpop.f32.mrf.mxu3 }
 0x134   : > { %v452_v26 = vadd.f32 %v451_v25, %v375_v13  ;;  %v521_v27 = vpop.f32.mrf.mxu0 }
 0x135   : > { %v562_v28 = vadd.f32 %v521_v27, %v420_v16  ;;  %v550_v29 = vpop.f32.mrf.mxu1 }
 0x136   : > { %v563_v30 = vadd.f32 %v550_v29, %v449_v18 }
 0x13a   : > { %v425_v31 = vpop.f32.mrf.mxu2 }
 0x13b   : > { %v426_v32 = vadd.f32 %v425_v31, %v349_v19  ;;  %v454_v33 = vpop.f32.mrf.mxu3 }
 0x13c   : > { %v455_v34 = vadd.f32 %v454_v33, %v378_v21  ;;  %v524_v35 = vpop.f32.mrf.mxu0 }
 0x13d   : > { %v564_v36 = vadd.f32 %v524_v35, %v423_v24  ;;  %v553_v37 = vpop.f32.mrf.mxu1 }
 0x13e   : > { %v565_v38 = vadd.f32 %v553_v37, %v452_v26  ;;  %v1232_v37 = vpop.permute.xlu1 %1231 }
 0x142   : > { %v428_v39 = vpop.f32.mrf.mxu2 }
 0x143   : > { %v429_v40 = vadd.f32 %v428_v39, %v352_v9  ;;  %v457_v41 = vpop.f32.mrf.mxu3 }
 0x144   : > { %v458_v42 = vadd.f32 %v457_v41, %v381_v10  ;;  %v527_v43 = vpop.f32.mrf.mxu0 }
 0x145   : > { %v566_v44 = vadd.f32 %v527_v43, %v426_v32  ;;  %v556_v45 = vpop.f32.mrf.mxu1 }
 0x146   : > { %v567_v46 = vadd.f32 %v556_v45, %v455_v34 }
 0x14a   : > { %v631_v47 = vpop.f32.mrf.mxu2 }
 0x14b   : > { %v672_v48 = vadd.f32 %v631_v47, %v562_v28  ;;  %v660_v49 = vpop.f32.mrf.mxu3  ;;  %v1222_v47 = vpop.permute.xlu1 %1221 }
 0x14c   : > { %v673_v50 = vadd.f32 %v660_v49, %v563_v30  ;;  %v530_v23 = vpop.f32.mrf.mxu0 }
 0x14d   : > { %v568_v51 = vadd.f32 %v530_v23, %v429_v40  ;;  %v559_v52 = vpop.f32.mrf.mxu1 }
 0x14e   : > { %v569_v53 = vadd.f32 %v559_v52, %v458_v42 }
 0x152   : > { %v634_v54 = vpop.f32.mrf.mxu2 }
 0x153   : > { %v674_v55 = vadd.f32 %v634_v54, %v564_v36  ;;  %v663_v56 = vpop.f32.mrf.mxu3 }
 0x154   : > { %v675_v57 = vadd.f32 %v663_v56, %v565_v38  ;;  %v721_v58 = vpop.f32.mrf.mxu0  ;;  %v1227_v38 = vpop.permute.xlu2 %1226 }
 0x155   : > { %v762_v59 = vadd.f32 %v721_v58, %v672_v48  ;;  %v750_v60 = vpop.f32.mrf.mxu1 }
 0x156   : > { %v1880_v61 = vadd.f32 %v750_v60, %v673_v50 }
 0x15a   : > { %v637_v62 = vpop.f32.mrf.mxu2 }
 0x15b   : > { %v676_v63 = vadd.f32 %v637_v62, %v566_v44  ;;  %v666_v0 = vpop.f32.mrf.mxu3 }
 0x15c   : > { %v677_v1 = vadd.f32 %v666_v0, %v567_v46  ;;  %v724_v2 = vpop.f32.mrf.mxu0 }
 0x15d   : > { %v764_v3 = vadd.f32 %v724_v2, %v674_v55  ;;  %v753_v4 = vpop.f32.mrf.mxu1 }
 0x15e   : > { %v765_v5 = vadd.f32 %v753_v4, %v675_v57  ;;  %v1259_v57 = vpop.permute.xlu2 %1258 }
 0x162   : > { %v640_v6 = vpop.f32.mrf.mxu2 }
 0x163   : > { %v669_v7 = vpop.f32.mrf.mxu3  ;;  %v678_v43 = vadd.f32 %v640_v6, %v568_v51 }
 0x164   : > { %v727_v8 = vpop.f32.mrf.mxu0  ;;  %v679_v45 = vadd.f32 %v669_v7, %v569_v53  ;;  %v1264_v53 = vpop.permute.xlu0 %1263 }
 0x165   : > { %v766_v9 = vadd.f32 %v727_v8, %v676_v63  ;;  %v756_v10 = vpop.f32.mrf.mxu1 }
 0x166   : > { %v767_v11 = vadd.f32 %v756_v10, %v677_v1 }
 0x16a   : > { %v831_v12 = vpop.f32.mrf.mxu2 }
 0x16b   : > { %v860_v13 = vpop.f32.mrf.mxu3  ;;  %v872_v58 = vadd.f32 %v831_v12, %v762_v59 }
 0x16c   : > { %v730_v14 = vpop.f32.mrf.mxu0  ;;  %v873_v0 = vadd.f32 %v860_v13, %v1880_v61 }
 0x16d   : > { %v759_v15 = vpop.f32.mrf.mxu1  ;;  %v768_v49 = vadd.f32 %v730_v14, %v678_v43 }
 0x16e   : > { %v769_v54 = vadd.f32 %v759_v15, %v679_v45 }
 0x172   : > { %v834_v16 = vpop.f32.mrf.mxu2 }
 0x173   : > { %v863_v17 = vpop.f32.mrf.mxu3  ;;  %v874_v50 = vadd.f32 %v834_v16, %v764_v3 }
 0x174   : > { %v941_v18 = vpop.f32.mrf.mxu0  ;;  %v875_v55 = vadd.f32 %v863_v17, %v765_v5 }
 0x175   : > { %v970_v19 = vpop.f32.mrf.mxu1  ;;  %v982_v6 = vadd.f32 %v941_v18, %v872_v58 }
 0x176   : > { %v983_v10 = vadd.f32 %v970_v19, %v873_v0 }
 0x17a   : > { %v837_v20 = vpop.f32.mrf.mxu2 }
 0x17b   : > { %v866_v21 = vpop.f32.mrf.mxu3  ;;  %v876_v44 = vadd.f32 %v837_v20, %v766_v9 }
 0x17c   : > { %v944_v22 = vpop.f32.mrf.mxu0  ;;  %v877_v46 = vadd.f32 %v866_v21, %v767_v11 }
 0x17d   : > { %v973_v24 = vpop.f32.mrf.mxu1  ;;  %v984_v60 = vadd.f32 %v944_v22, %v874_v50  ;;  %v1282_v50 = vld [vmem:[%s1898_s5] sm:$0xff] }
 0x17e   : > { %v985_v51 = vadd.f32 %v973_v24, %v875_v55 }
 0x182   : > { %v840_v25 = vpop.f32.mrf.mxu2 }
 0x183   : > { %v869_v26 = vpop.f32.mrf.mxu3  ;;  %v878_v62 = vadd.f32 %v840_v25, %v768_v49  ;;  %v1217_v25 = vpop.permute.xlu1 %1216 }
 0x184   : > { %v947_v27 = vpop.f32.mrf.mxu0  ;;  %v879_v1 = vadd.f32 %v869_v26, %v769_v54 }
 0x185   : > { %v976_v28 = vpop.f32.mrf.mxu1  ;;  %v986_v23 = vadd.f32 %v947_v27, %v876_v44 }
 0x186   : > { %v987_v56 = vadd.f32 %v976_v28, %v877_v46 }
 0x18a   : > { %v1051_v29 = vpop.f32.mrf.mxu2 }
 0x18b   : > { %v1080_v30 = vpop.f32.mrf.mxu3  ;;  %v1092_v59 = vadd.f32 %v1051_v29, %v982_v6 }
 0x18c   : > { %v950_v31 = vpop.f32.mrf.mxu0  ;;  %v1093_v16 = vadd.f32 %v1080_v30, %v983_v10 }
 0x18d   : > { %v979_v32 = vpop.f32.mrf.mxu1  ;;  %v988_v7 = vadd.f32 %v950_v31, %v878_v62 }
 0x18e   : > { %v989_v5 = vadd.f32 %v979_v32, %v879_v1  ;;  %v1254_v32 = vpop.permute.xlu2 %1253 }
 0x192   : > { %v1054_v33 = vpop.f32.mrf.mxu2 }
 0x193   : > { %v1083_v35 = vpop.f32.mrf.mxu3  ;;  %v1094_v3 = vadd.f32 %v1054_v33, %v984_v60 }
 0x194   : > { %v1161_v34 = vpop.f32.mrf.mxu0  ;;  %v1095_v11 = vadd.f32 %v1083_v35, %v985_v51 }
 0x195   : > { %v1190_v36 = vpop.f32.mrf.mxu1  ;;  %v1202_v20 = vadd.f32 %v1161_v34, %v1092_v59 }
 0x196   : > { %v1203_v18 = vadd.f32 %v1190_v36, %v1093_v16 }
 0x197   : > { %v1234_v29 = vmul.f32 %v1217_v25, %v1202_v20 }
 0x198   : > { %v1235_v30 = vmul.f32 %v1217_v25, %v1203_v18 }
 0x19a   : > { %v1057_v41 = vpop.f32.mrf.mxu2 }
 0x19b   : > { %v1086_v42 = vpop.f32.mrf.mxu3  ;;  %v1096_v63 = vadd.f32 %v1057_v41, %v986_v23 }
 0x19c   : > { %v1164_v39 = vpop.f32.mrf.mxu0  ;;  %v1097_v2 = vadd.f32 %v1086_v42, %v987_v56 }
 0x19d   : > { %v1193_v40 = vpop.f32.mrf.mxu1  ;;  %v1204_v12 = vadd.f32 %v1164_v39, %v1094_v3 }
 0x19e   : > { %v1205_v17 = vadd.f32 %v1193_v40, %v1095_v11  ;;  %v1249_v40 = vpop.permute.xlu0 %1248 }
 0x19f   : > { %v1236_v28 = vmul.f32 %v1222_v47, %v1204_v12  ;;  %v1266_v36 = vadd.f32 %v1249_v40, %v1234_v29  ;;  %v1267_v46 = vadd.f32 %v1249_v40, %v1235_v30 }
 0x1a0   : > { %v1237_v31 = vmul.f32 %v1222_v47, %v1205_v17 }
 0x1a1   : > { %v1268_v34 = vadd.f32 %v1254_v32, %v1236_v28  ;;  %v1274_v49 = vmax.f32 %v1266_v36, 0.0  ;;  %v1275_v23 = vmax.f32 %v1267_v46, 0.0 }
 0x1a2   : > { %v1060_v4 = vpop.f32.mrf.mxu2  ;;  %v1269_v44 = vadd.f32 %v1254_v32, %v1237_v31 }
 0x1a3   : > { %v1089_v8 = vpop.f32.mrf.mxu3  ;;  %v1098_v15 = vadd.f32 %v1060_v4, %v988_v7 }
 0x1a4   : > { %v1167_v48 = vpop.f32.mrf.mxu0  ;;  %v1099_v61 = vadd.f32 %v1089_v8, %v989_v5 }
 0x1a5   : > { %v1196_v52 = vpop.f32.mrf.mxu1  ;;  %v1206_v9 = vadd.f32 %v1167_v48, %v1096_v63  ;;  %v1276_v48 = vmax.f32 %v1268_v34, 0.0 }
 0x1a6   : > { %v1207_v14 = vadd.f32 %v1196_v52, %v1097_v2 }
 0x1a7   : > { %v1238_v21 = vmul.f32 %v1227_v38, %v1206_v9 }
 0x1a8   : > { %v1239_v26 = vmul.f32 %v1227_v38, %v1207_v14 }
 0x1a9   : > { %v1270_v39 = vadd.f32 %v1259_v57, %v1238_v21 }
 0x1aa   : > { %v1271_v42 = vadd.f32 %v1259_v57, %v1239_v26 }
 0x1ab   : > { %v1278_v38 = vmax.f32 %v1270_v39, 0.0 }
 0x1ac   : > { %v1170_v13 = vpop.f32.mrf.mxu0  ;;  %v1279_v47 = vmax.f32 %v1271_v42, 0.0 }
 0x1ad   : > { %v1208_v22 = vadd.f32 %v1170_v13, %v1098_v15  ;;  %v1199_v24 = vpop.f32.mrf.mxu1 }
 0x1ae   : > { %v1209_v27 = vadd.f32 %v1199_v24, %v1099_v61 }
 0x1af   : > { %v1240_v19 = vmul.f32 %v1232_v37, %v1208_v22 }
 0x1b0   : > { %v1241_v33 = vmul.f32 %v1232_v37, %v1209_v27  ;;  %v1277_v37 = vmax.f32 %v1269_v44, 0.0 }
 0x1b1   : > { %v1272_v35 = vadd.f32 %v1264_v53, %v1240_v19 }
 0x1b2   : > { %v1273_v41 = vadd.f32 %v1264_v53, %v1241_v33 }
 0x1b3   : > { %v1280_v43 = vmax.f32 %v1272_v35, 0.0 }
 0x1b4   : > { %v1281_v45 = vmax.f32 %v1273_v41, 0.0 }
 0x1b5   : > { %1299 = vmatpush.msrb.mxu2 %v1280_v43 }
 0x1b6   : > { %1319 = vmatpush.msrb.mxu3 %v1281_v45 }
 0x1b7   : > { %1300 = vmatpush.msrb.mxu2 %v1278_v38 }
 0x1b8   : > { %1320 = vmatpush.msrb.mxu3 %v1279_v47 }
 0x1b9   : > { %1301 = vmatpush.msrb.mxu2 %v1276_v48 }
 0x1ba   : > { %1321 = vmatpush.msrb.mxu3 %v1277_v37 }
 0x1bb   : > { %1302 = vmatpush.msrb.mxu2 %v1274_v49 }
 0x1bc   : > { %1322 = vmatpush.msrb.mxu3 %v1275_v23  ;;  %1522 = vmatmul.msk.f32.vlgmr.msrb.gmra.mxu2 %vm1283_vm10, %v1282_v50 }
 0x1bd   : > { %1523 = vmatmul.msk.f32.vlgmr.msrb.gmra.mxu3 %vm1283_vm10, %v1282_v50 }
 0x23f   : > { %v1304_v52 = vpop.f32.mrf.mxu2 }
 0x240   : > { %1327 = vst [vmem:[%s251_s10] sm:$0xff] %v1304_v52  ;;  %v1324_v54 = vpop.f32.mrf.mxu3 }
 0x241   : > { %1328 = vst [vmem:[%s251_s10 + $0x8] sm:$0xff] %v1324_v54 }
 0x242 PF: > { %s16_s21 = sadd.s32 1, %s1556_s21  }
 0x243   : > { %p13_p4 = scmp.ge.s32.totalorder %s16_s21, 4  }
 0x245   :  { %15 = sbr.rel (!%p13_p4) target bundleno = 1 (0x1), region = 89 }

</bundles_post_ra>
